<compile_context>
chip_gen: v7x
topology: tpu7x:2x2x1
jax: 0.10.0
libtpu: 0.0.40
codegen_flags: <defaults>
</compile_context>

<pallas_src>
import functools
import math

import jax
import jax.numpy as jnp
from jax import lax
from jax.experimental import pallas as pl
from jax.experimental.pallas import tpu as pltpu


def _round_up(x, m):
    return (x + m - 1) // m * m


# ---------------------------------------------------------------------------
# Path 1: large vocabulary -- table stays in HBM, DMA row-gather into out_ref.
# ---------------------------------------------------------------------------
def _gather_kernel(tok_ref, emb_hbm, out_ref, dma_sem, *, scale, tile_n):
    """Gather tile_n embedding rows from HBM directly into the output tile.

    tok_ref : SMEM (BS_pad,) int32   -- scalar-prefetched token ids
    emb_hbm : ANY/HBM (V, D)         -- embedding table, never resident in VMEM
    out_ref : VMEM (tile_n, D)       -- current (double-buffered) output tile
    dma_sem : DMA semaphore (1,)     -- shared by all row copies of this tile
    """
    base = pl.multiple_of(pl.program_id(0) * tile_n, tile_n)

    def issue(r, carry):
        tid = tok_ref[base + r]                       # scalar load from SMEM
        pltpu.make_async_copy(
            emb_hbm.at[pl.ds(tid, 1), :],             # one (1, D) row in HBM
            out_ref.at[pl.ds(r, 1), :],               # straight into the tile
            dma_sem.at[0],
        ).start()
        return carry

    # Unrolled so descriptor builds co-issue across the two scalar slots and
    # overlap with already-in-flight DMAs.
    lax.fori_loop(0, tile_n, issue, 0, unroll=8)

    # ONE wait for the whole tile: DMA semaphores count bytes, and tile_n row
    # copies of D*itemsize bytes sum to exactly one (tile_n, D) descriptor.
    # (All row copies must keep this identical size for the math to hold.)
    pltpu.make_async_copy(out_ref, out_ref, dma_sem.at[0]).wait()

    # Scale in f32 (exact vs. an f32 reference even for bf16 tables), cast on
    # store.  TODO(synk): fold sqrt(d_model) into the table once at parameter
    # load time to make this a pure gather when the caller controls params.
    out_ref[...] = (out_ref[...].astype(jnp.float32) * scale).astype(out_ref.dtype)


def _token_encoding_gather(tok_flat, emb_table, scale, tile_n):
    V, D = emb_table.shape
    BS = tok_flat.shape[0]
    itemsize = jnp.dtype(emb_table.dtype).itemsize

    # Two pipeline-managed output buffers per step must fit a conservative
    # budget (v7x has only 64 MiB VMEM / 32 MiB scoped default).
    max_tile = max(8, ((24 << 20) // (2 * D * itemsize)) // 8 * 8)
    tile = max(8, min(tile_n, max_tile, _round_up(BS, 8)))
    n_tiles = pl.cdiv(BS, tile)
    BS_pad = n_tiles * tile
    if BS_pad != BS:
        # Padded ids gather row 0; those rows are sliced off by the caller.
        tok_flat = jnp.pad(tok_flat, (0, BS_pad - BS))

    tile_bytes = tile * D * itemsize
    vmem_limit = int(min(max(2 * tile_bytes + (4 << 20), 16 << 20), 48 << 20))

    out = pl.pallas_call(
        functools.partial(_gather_kernel, scale=scale, tile_n=tile),
        out_shape=jax.ShapeDtypeStruct((BS_pad, D), emb_table.dtype),
        grid_spec=pltpu.PrefetchScalarGridSpec(
            num_scalar_prefetch=1,                    # token ids -> SMEM
            grid=(n_tiles,),
            in_specs=[pl.BlockSpec(memory_space=pl.ANY)],   # table stays in HBM
            out_specs=pl.BlockSpec((tile, D), lambda i, tok: (i, 0)),
            scratch_shapes=[pltpu.SemaphoreType.DMA((1,))],
        ),
        compiler_params=pltpu.CompilerParams(
            # Each step is self-contained (semaphore drained to zero), so the
            # grid axis can shard across both v7x TensorCores.
            # TODO(synk): verify megacore sharding on v7x; fall back to an
            # explicit CORE_PARALLEL leading axis if it does not.
            dimension_semantics=("parallel",),
            vmem_limit_bytes=vmem_limit,
        ),
    )(tok_flat, emb_table)
    return out[:BS]


# ---------------------------------------------------------------------------
# Path 2: small table -- table resident in VMEM, gather via in-VMEM slices.
# ---------------------------------------------------------------------------
def _small_table_kernel(tok_ref, emb_ref, out_ref, *, scale, tile_n):
    """tok_ref: SMEM ids; emb_ref: (V, D) resident table; out_ref: (tile_n, D)."""
    base = pl.multiple_of(pl.program_id(0) * tile_n, tile_n)
    # tile_n is small on this path; a static unroll keeps every store at a
    # static sublane offset (cheap, and bit-exact vs. the f32 reference).
    # TODO(synk): a one-hot MXU matmul would vectorize this loop for larger
    # small-vocab workloads; kept as slices for exact f32 parity.
    for r in range(tile_n):
        tid = tok_ref[base + r]
        row = emb_ref[pl.ds(tid, 1), :]               # (1, D) in-VMEM slice
        out_ref[pl.ds(r, 1), :] = (row.astype(jnp.float32) * scale).astype(out_ref.dtype)


def _token_encoding_small(tok_flat, emb_table, scale, tile_n):
    V, D = emb_table.shape
    BS = tok_flat.shape[0]
    itemsize = jnp.dtype(emb_table.dtype).itemsize

    tile = max(8, min(tile_n, 64, _round_up(BS, 8)))   # cap the static unroll
    n_tiles = pl.cdiv(BS, tile)
    BS_pad = n_tiles * tile
    if BS_pad != BS:
        tok_flat = jnp.pad(tok_flat, (0, BS_pad - BS))

    table_bytes = V * D * itemsize
    vmem_limit = int(min(max(2 * table_bytes + 2 * tile * D * itemsize + (4 << 20),
                             16 << 20), 32 << 20))

    out = pl.pallas_call(
        functools.partial(_small_table_kernel, scale=scale, tile_n=tile),
        out_shape=jax.ShapeDtypeStruct((BS_pad, D), emb_table.dtype),
        grid_spec=pltpu.PrefetchScalarGridSpec(
            num_scalar_prefetch=1,                    # token ids -> SMEM
            grid=(n_tiles,),
            # Grid-invariant block: DMA'd once, stays resident across steps.
            in_specs=[pl.BlockSpec((V, D), lambda i, tok: (0, 0))],
            out_specs=pl.BlockSpec((tile, D), lambda i, tok: (i, 0)),
        ),
        compiler_params=pltpu.CompilerParams(
            dimension_semantics=("arbitrary",),
            vmem_limit_bytes=vmem_limit,
        ),
    )(tok_flat, emb_table)
    return out[:BS]


# ---------------------------------------------------------------------------
# Public wrapper: TokenEncoding.forward
# ---------------------------------------------------------------------------
def token_encoding(tokens, emb_table, *, tile_n=512, force_gather=False):
    """tokens: (B, S) int ids; emb_table: (V, D) -> (B, S, D) = emb(x)*sqrt(D)."""
    B, S = tokens.shape
    V, D = emb_table.shape
    scale = float(math.sqrt(D))
    itemsize = jnp.dtype(emb_table.dtype).itemsize
    BS = B * S

    # nn.Embedding raises on out-of-range ids; here they are clamped so an
    # invalid id can never become an out-of-bounds HBM DMA.
    # TODO(synk): no clean in-kernel equivalent of PyTorch's index error.
    tok_flat = jnp.clip(tokens.reshape(BS).astype(jnp.int32), 0, V - 1)

    # Small-table fast path threshold: resident table must fit comfortably in
    # VMEM even on v7x (64 MiB total / 32 MiB scoped default).
    table_bytes = V * D * itemsize
    if (not force_gather) and table_bytes <= (4 << 20):
        out_flat = _token_encoding_small(tok_flat, emb_table, scale, tile_n)
    else:
        out_flat = _token_encoding_gather(tok_flat, emb_table, scale, tile_n)

    return out_flat[:BS].reshape(B, S, D)


if __name__ == "__main__":
    # Small, deterministic config consistent with the module's forward.
    vocab_size = 32
    d_model = 32
    max_len = 16       # constructor arg, unused by forward (matches PyTorch)
    batch = 2
    seq = 8

    key = jax.random.PRNGKey(0)
    k_emb, k_tok = jax.random.split(key)

    # Deterministic "parameters": embedding weight ~ N(0, 1), like nn.Embedding.
    emb_table = jax.random.normal(k_emb, (vocab_size, d_model), dtype=jnp.float32)
    tokens = jax.random.randint(k_tok, (batch, seq), 0, vocab_size, dtype=jnp.int32)

    # Reference: nn.Embedding(x) * sqrt(d_model).
    ref = jnp.take(emb_table, tokens, axis=0) * math.sqrt(d_model)

    # Small-table fast path (table resident in VMEM).
    out = jax.block_until_ready(token_encoding(tokens, emb_table))
    assert out.shape == (batch, seq, d_model)
    assert jnp.allclose(out, ref, atol=1e-5, rtol=1e-5), "fast path mismatch"

    # Large-vocab path (HBM row-gather DMA) exercised on the same small shapes
    # to make sure it also compiles and runs cleanly.
    out_g = jax.block_until_ready(token_encoding(tokens, emb_table, force_gather=True))
    assert out_g.shape == (batch, seq, d_model)
    assert jnp.allclose(out_g, ref, atol=1e-5, rtol=1e-5), "gather path mismatch"

    print("KERNEL_OK")
</pallas_src>

<mosaic_0001>
module attributes {stable_mosaic.version = 11 : i64} {
  func.func @_small_table_kernel(%arg0: i32, %arg1: memref<16xi32, #tpu.memory_space<smem>>, %arg2: memref<32x32xf32, #tpu.memory_space<vmem>>, %arg3: memref<16x32xf32, #tpu.memory_space<vmem>>) attributes {dimension_semantics = [#tpu.dimension_semantics<arbitrary>], iteration_bounds = array<i64: 1>, scalar_prefetch = 1 : i64, scratch_operands = 0 : i64, tpu.core_type = #tpu.core_type<tc>, window_params = [{pipeline_mode = #tpu.pipeline_mode<synchronous>, transform_indices = @transform_0, window_bounds = array<i64: 32, 32>}, {transform_indices = @transform_1, window_bounds = array<i64: 16, 32>}]} {
    %c16_i32 = arith.constant 16 : i32
    %0 = arith.muli %arg0, %c16_i32 : i32
    %1 = tpu.assume_multiple %0, 16 : i32
    %c0_i32 = arith.constant 0 : i32
    %2 = arith.addi %1, %c0_i32 : i32
    %3 = arith.index_cast %2 : i32 to index
    %4 = memref.load %arg1[%3] : memref<16xi32, #tpu.memory_space<smem>>
    %5 = arith.index_cast %4 : i32 to index
    %c0 = arith.constant 0 : index
    %6 = vector.load %arg2[%5, %c0] : memref<32x32xf32, #tpu.memory_space<vmem>>, vector<1x32xf32>
    %cst = arith.constant 5.65685415 : f32
    %7 = vector.broadcast %cst : f32 to vector<1x32xf32>
    %8 = arith.mulf %6, %7 : vector<1x32xf32>
    %c0_0 = arith.constant 0 : index
    %c0_1 = arith.constant 0 : index
    %9 = vector.load %arg3[%c0_0, %c0_1] : memref<16x32xf32, #tpu.memory_space<vmem>>, vector<1x32xf32>
    tpu.vector_store %arg3[%c0_0, %c0_1], %8 {strides = array<i32>} : memref<16x32xf32, #tpu.memory_space<vmem>>, vector<1x32xf32>,
    %c1_i32 = arith.constant 1 : i32
    %10 = arith.addi %1, %c1_i32 : i32
    %11 = arith.index_cast %10 : i32 to index
    %12 = memref.load %arg1[%11] : memref<16xi32, #tpu.memory_space<smem>>
    %13 = arith.index_cast %12 : i32 to index
    %c0_2 = arith.constant 0 : index
    %14 = vector.load %arg2[%13, %c0_2] : memref<32x32xf32, #tpu.memory_space<vmem>>, vector<1x32xf32>
    %cst_3 = arith.constant 5.65685415 : f32
    %15 = vector.broadcast %cst_3 : f32 to vector<1x32xf32>
    %16 = arith.mulf %14, %15 : vector<1x32xf32>
    %c1 = arith.constant 1 : index
    %c0_4 = arith.constant 0 : index
    %17 = vector.load %arg3[%c1, %c0_4] : memref<16x32xf32, #tpu.memory_space<vmem>>, vector<1x32xf32>
    tpu.vector_store %arg3[%c1, %c0_4], %16 {strides = array<i32>} : memref<16x32xf32, #tpu.memory_space<vmem>>, vector<1x32xf32>,
    %c2_i32 = arith.constant 2 : i32
    %18 = arith.addi %1, %c2_i32 : i32
    %19 = arith.index_cast %18 : i32 to index
    %20 = memref.load %arg1[%19] : memref<16xi32, #tpu.memory_space<smem>>
    %21 = arith.index_cast %20 : i32 to index
    %c0_5 = arith.constant 0 : index
    %22 = vector.load %arg2[%21, %c0_5] : memref<32x32xf32, #tpu.memory_space<vmem>>, vector<1x32xf32>
    %cst_6 = arith.constant 5.65685415 : f32
    %23 = vector.broadcast %cst_6 : f32 to vector<1x32xf32>
    %24 = arith.mulf %22, %23 : vector<1x32xf32>
    %c2 = arith.constant 2 : index
    %c0_7 = arith.constant 0 : index
    %25 = vector.load %arg3[%c2, %c0_7] : memref<16x32xf32, #tpu.memory_space<vmem>>, vector<1x32xf32>
    tpu.vector_store %arg3[%c2, %c0_7], %24 {strides = array<i32>} : memref<16x32xf32, #tpu.memory_space<vmem>>, vector<1x32xf32>,
    %c3_i32 = arith.constant 3 : i32
    %26 = arith.addi %1, %c3_i32 : i32
    %27 = arith.index_cast %26 : i32 to index
    %28 = memref.load %arg1[%27] : memref<16xi32, #tpu.memory_space<smem>>
    %29 = arith.index_cast %28 : i32 to index
    %c0_8 = arith.constant 0 : index
    %30 = vector.load %arg2[%29, %c0_8] : memref<32x32xf32, #tpu.memory_space<vmem>>, vector<1x32xf32>
    %cst_9 = arith.constant 5.65685415 : f32
    %31 = vector.broadcast %cst_9 : f32 to vector<1x32xf32>
    %32 = arith.mulf %30, %31 : vector<1x32xf32>
    %c3 = arith.constant 3 : index
    %c0_10 = arith.constant 0 : index
    %33 = vector.load %arg3[%c3, %c0_10] : memref<16x32xf32, #tpu.memory_space<vmem>>, vector<1x32xf32>
    tpu.vector_store %arg3[%c3, %c0_10], %32 {strides = array<i32>} : memref<16x32xf32, #tpu.memory_space<vmem>>, vector<1x32xf32>,
    %c4_i32 = arith.constant 4 : i32
    %34 = arith.addi %1, %c4_i32 : i32
    %35 = arith.index_cast %34 : i32 to index
    %36 = memref.load %arg1[%35] : memref<16xi32, #tpu.memory_space<smem>>
    %37 = arith.index_cast %36 : i32 to index
    %c0_11 = arith.constant 0 : index
    %38 = vector.load %arg2[%37, %c0_11] : memref<32x32xf32, #tpu.memory_space<vmem>>, vector<1x32xf32>
    %cst_12 = arith.constant 5.65685415 : f32
    %39 = vector.broadcast %cst_12 : f32 to vector<1x32xf32>
    %40 = arith.mulf %38, %39 : vector<1x32xf32>
    %c4 = arith.constant 4 : index
    %c0_13 = arith.constant 0 : index
    %41 = vector.load %arg3[%c4, %c0_13] : memref<16x32xf32, #tpu.memory_space<vmem>>, vector<1x32xf32>
    tpu.vector_store %arg3[%c4, %c0_13], %40 {strides = array<i32>} : memref<16x32xf32, #tpu.memory_space<vmem>>, vector<1x32xf32>,
    %c5_i32 = arith.constant 5 : i32
    %42 = arith.addi %1, %c5_i32 : i32
    %43 = arith.index_cast %42 : i32 to index
    %44 = memref.load %arg1[%43] : memref<16xi32, #tpu.memory_space<smem>>
    %45 = arith.index_cast %44 : i32 to index
    %c0_14 = arith.constant 0 : index
    %46 = vector.load %arg2[%45, %c0_14] : memref<32x32xf32, #tpu.memory_space<vmem>>, vector<1x32xf32>
    %cst_15 = arith.constant 5.65685415 : f32
    %47 = vector.broadcast %cst_15 : f32 to vector<1x32xf32>
    %48 = arith.mulf %46, %47 : vector<1x32xf32>
    %c5 = arith.constant 5 : index
    %c0_16 = arith.constant 0 : index
    %49 = vector.load %arg3[%c5, %c0_16] : memref<16x32xf32, #tpu.memory_space<vmem>>, vector<1x32xf32>
    tpu.vector_store %arg3[%c5, %c0_16], %48 {strides = array<i32>} : memref<16x32xf32, #tpu.memory_space<vmem>>, vector<1x32xf32>,
    %c6_i32 = arith.constant 6 : i32
    %50 = arith.addi %1, %c6_i32 : i32
    %51 = arith.index_cast %50 : i32 to index
    %52 = memref.load %arg1[%51] : memref<16xi32, #tpu.memory_space<smem>>
    %53 = arith.index_cast %52 : i32 to index
    %c0_17 = arith.constant 0 : index
    %54 = vector.load %arg2[%53, %c0_17] : memref<32x32xf32, #tpu.memory_space<vmem>>, vector<1x32xf32>
    %cst_18 = arith.constant 5.65685415 : f32
    %55 = vector.broadcast %cst_18 : f32 to vector<1x32xf32>
    %56 = arith.mulf %54, %55 : vector<1x32xf32>
    %c6 = arith.constant 6 : index
    %c0_19 = arith.constant 0 : index
    %57 = vector.load %arg3[%c6, %c0_19] : memref<16x32xf32, #tpu.memory_space<vmem>>, vector<1x32xf32>
    tpu.vector_store %arg3[%c6, %c0_19], %56 {strides = array<i32>} : memref<16x32xf32, #tpu.memory_space<vmem>>, vector<1x32xf32>,
    %c7_i32 = arith.constant 7 : i32
    %58 = arith.addi %1, %c7_i32 : i32
    %59 = arith.index_cast %58 : i32 to index
    %60 = memref.load %arg1[%59] : memref<16xi32, #tpu.memory_space<smem>>
    %61 = arith.index_cast %60 : i32 to index
    %c0_20 = arith.constant 0 : index
    %62 = vector.load %arg2[%61, %c0_20] : memref<32x32xf32, #tpu.memory_space<vmem>>, vector<1x32xf32>
    %cst_21 = arith.constant 5.65685415 : f32
    %63 = vector.broadcast %cst_21 : f32 to vector<1x32xf32>
    %64 = arith.mulf %62, %63 : vector<1x32xf32>
    %c7 = arith.constant 7 : index
    %c0_22 = arith.constant 0 : index
    %65 = vector.load %arg3[%c7, %c0_22] : memref<16x32xf32, #tpu.memory_space<vmem>>, vector<1x32xf32>
    tpu.vector_store %arg3[%c7, %c0_22], %64 {strides = array<i32>} : memref<16x32xf32, #tpu.memory_space<vmem>>, vector<1x32xf32>,
    %c8_i32 = arith.constant 8 : i32
    %66 = arith.addi %1, %c8_i32 : i32
    %67 = arith.index_cast %66 : i32 to index
    %68 = memref.load %arg1[%67] : memref<16xi32, #tpu.memory_space<smem>>
    %69 = arith.index_cast %68 : i32 to index
    %c0_23 = arith.constant 0 : index
    %70 = vector.load %arg2[%69, %c0_23] : memref<32x32xf32, #tpu.memory_space<vmem>>, vector<1x32xf32>
    %cst_24 = arith.constant 5.65685415 : f32
    %71 = vector.broadcast %cst_24 : f32 to vector<1x32xf32>
    %72 = arith.mulf %70, %71 : vector<1x32xf32>
    %c8 = arith.constant 8 : index
    %c0_25 = arith.constant 0 : index
    %73 = vector.load %arg3[%c8, %c0_25] : memref<16x32xf32, #tpu.memory_space<vmem>>, vector<1x32xf32>
    tpu.vector_store %arg3[%c8, %c0_25], %72 {strides = array<i32>} : memref<16x32xf32, #tpu.memory_space<vmem>>, vector<1x32xf32>,
    %c9_i32 = arith.constant 9 : i32
    %74 = arith.addi %1, %c9_i32 : i32
    %75 = arith.index_cast %74 : i32 to index
    %76 = memref.load %arg1[%75] : memref<16xi32, #tpu.memory_space<smem>>
    %77 = arith.index_cast %76 : i32 to index
    %c0_26 = arith.constant 0 : index
    %78 = vector.load %arg2[%77, %c0_26] : memref<32x32xf32, #tpu.memory_space<vmem>>, vector<1x32xf32>
    %cst_27 = arith.constant 5.65685415 : f32
    %79 = vector.broadcast %cst_27 : f32 to vector<1x32xf32>
    %80 = arith.mulf %78, %79 : vector<1x32xf32>
    %c9 = arith.constant 9 : index
    %c0_28 = arith.constant 0 : index
    %81 = vector.load %arg3[%c9, %c0_28] : memref<16x32xf32, #tpu.memory_space<vmem>>, vector<1x32xf32>
    tpu.vector_store %arg3[%c9, %c0_28], %80 {strides = array<i32>} : memref<16x32xf32, #tpu.memory_space<vmem>>, vector<1x32xf32>,
    %c10_i32 = arith.constant 10 : i32
    %82 = arith.addi %1, %c10_i32 : i32
    %83 = arith.index_cast %82 : i32 to index
    %84 = memref.load %arg1[%83] : memref<16xi32, #tpu.memory_space<smem>>
    %85 = arith.index_cast %84 : i32 to index
    %c0_29 = arith.constant 0 : index
    %86 = vector.load %arg2[%85, %c0_29] : memref<32x32xf32, #tpu.memory_space<vmem>>, vector<1x32xf32>
    %cst_30 = arith.constant 5.65685415 : f32
    %87 = vector.broadcast %cst_30 : f32 to vector<1x32xf32>
    %88 = arith.mulf %86, %87 : vector<1x32xf32>
    %c10 = arith.constant 10 : index
    %c0_31 = arith.constant 0 : index
    %89 = vector.load %arg3[%c10, %c0_31] : memref<16x32xf32, #tpu.memory_space<vmem>>, vector<1x32xf32>
    tpu.vector_store %arg3[%c10, %c0_31], %88 {strides = array<i32>} : memref<16x32xf32, #tpu.memory_space<vmem>>, vector<1x32xf32>,
    %c11_i32 = arith.constant 11 : i32
    %90 = arith.addi %1, %c11_i32 : i32
    %91 = arith.index_cast %90 : i32 to index
    %92 = memref.load %arg1[%91] : memref<16xi32, #tpu.memory_space<smem>>
    %93 = arith.index_cast %92 : i32 to index
    %c0_32 = arith.constant 0 : index
    %94 = vector.load %arg2[%93, %c0_32] : memref<32x32xf32, #tpu.memory_space<vmem>>, vector<1x32xf32>
    %cst_33 = arith.constant 5.65685415 : f32
    %95 = vector.broadcast %cst_33 : f32 to vector<1x32xf32>
    %96 = arith.mulf %94, %95 : vector<1x32xf32>
    %c11 = arith.constant 11 : index
    %c0_34 = arith.constant 0 : index
    %97 = vector.load %arg3[%c11, %c0_34] : memref<16x32xf32, #tpu.memory_space<vmem>>, vector<1x32xf32>
    tpu.vector_store %arg3[%c11, %c0_34], %96 {strides = array<i32>} : memref<16x32xf32, #tpu.memory_space<vmem>>, vector<1x32xf32>,
    %c12_i32 = arith.constant 12 : i32
    %98 = arith.addi %1, %c12_i32 : i32
    %99 = arith.index_cast %98 : i32 to index
    %100 = memref.load %arg1[%99] : memref<16xi32, #tpu.memory_space<smem>>
    %101 = arith.index_cast %100 : i32 to index
    %c0_35 = arith.constant 0 : index
    %102 = vector.load %arg2[%101, %c0_35] : memref<32x32xf32, #tpu.memory_space<vmem>>, vector<1x32xf32>
    %cst_36 = arith.constant 5.65685415 : f32
    %103 = vector.broadcast %cst_36 : f32 to vector<1x32xf32>
    %104 = arith.mulf %102, %103 : vector<1x32xf32>
    %c12 = arith.constant 12 : index
    %c0_37 = arith.constant 0 : index
    %105 = vector.load %arg3[%c12, %c0_37] : memref<16x32xf32, #tpu.memory_space<vmem>>, vector<1x32xf32>
    tpu.vector_store %arg3[%c12, %c0_37], %104 {strides = array<i32>} : memref<16x32xf32, #tpu.memory_space<vmem>>, vector<1x32xf32>,
    %c13_i32 = arith.constant 13 : i32
    %106 = arith.addi %1, %c13_i32 : i32
    %107 = arith.index_cast %106 : i32 to index
    %108 = memref.load %arg1[%107] : memref<16xi32, #tpu.memory_space<smem>>
    %109 = arith.index_cast %108 : i32 to index
    %c0_38 = arith.constant 0 : index
    %110 = vector.load %arg2[%109, %c0_38] : memref<32x32xf32, #tpu.memory_space<vmem>>, vector<1x32xf32>
    %cst_39 = arith.constant 5.65685415 : f32
    %111 = vector.broadcast %cst_39 : f32 to vector<1x32xf32>
    %112 = arith.mulf %110, %111 : vector<1x32xf32>
    %c13 = arith.constant 13 : index
    %c0_40 = arith.constant 0 : index
    %113 = vector.load %arg3[%c13, %c0_40] : memref<16x32xf32, #tpu.memory_space<vmem>>, vector<1x32xf32>
    tpu.vector_store %arg3[%c13, %c0_40], %112 {strides = array<i32>} : memref<16x32xf32, #tpu.memory_space<vmem>>, vector<1x32xf32>,
    %c14_i32 = arith.constant 14 : i32
    %114 = arith.addi %1, %c14_i32 : i32
    %115 = arith.index_cast %114 : i32 to index
    %116 = memref.load %arg1[%115] : memref<16xi32, #tpu.memory_space<smem>>
    %117 = arith.index_cast %116 : i32 to index
    %c0_41 = arith.constant 0 : index
    %118 = vector.load %arg2[%117, %c0_41] : memref<32x32xf32, #tpu.memory_space<vmem>>, vector<1x32xf32>
    %cst_42 = arith.constant 5.65685415 : f32
    %119 = vector.broadcast %cst_42 : f32 to vector<1x32xf32>
    %120 = arith.mulf %118, %119 : vector<1x32xf32>
    %c14 = arith.constant 14 : index
    %c0_43 = arith.constant 0 : index
    %121 = vector.load %arg3[%c14, %c0_43] : memref<16x32xf32, #tpu.memory_space<vmem>>, vector<1x32xf32>
    tpu.vector_store %arg3[%c14, %c0_43], %120 {strides = array<i32>} : memref<16x32xf32, #tpu.memory_space<vmem>>, vector<1x32xf32>,
    %c15_i32 = arith.constant 15 : i32
    %122 = arith.addi %1, %c15_i32 : i32
    %123 = arith.index_cast %122 : i32 to index
    %124 = memref.load %arg1[%123] : memref<16xi32, #tpu.memory_space<smem>>
    %125 = arith.index_cast %124 : i32 to index
    %c0_44 = arith.constant 0 : index
    %126 = vector.load %arg2[%125, %c0_44] : memref<32x32xf32, #tpu.memory_space<vmem>>, vector<1x32xf32>
    %cst_45 = arith.constant 5.65685415 : f32
    %127 = vector.broadcast %cst_45 : f32 to vector<1x32xf32>
    %128 = arith.mulf %126, %127 : vector<1x32xf32>
    %c15 = arith.constant 15 : index
    %c0_46 = arith.constant 0 : index
    %129 = vector.load %arg3[%c15, %c0_46] : memref<16x32xf32, #tpu.memory_space<vmem>>, vector<1x32xf32>
    tpu.vector_store %arg3[%c15, %c0_46], %128 {strides = array<i32>} : memref<16x32xf32, #tpu.memory_space<vmem>>, vector<1x32xf32>,
    return
  }
  func.func @transform_0(%arg0: i32, %arg1: memref<16xi32, #tpu.memory_space<smem>>) -> (i32, i32) {
    %c0_i32 = arith.constant 0 : i32
    %c0_i32_0 = arith.constant 0 : i32
    %c0_i32_1 = arith.constant 0 : i32
    return %c0_i32, %c0_i32_0 : i32, i32
  }
  func.func @transform_1(%arg0: i32, %arg1: memref<16xi32, #tpu.memory_space<smem>>) -> (i32, i32) {
    %c0_i32 = arith.constant 0 : i32
    %c0_i32_0 = arith.constant 0 : i32
    return %arg0, %c0_i32 : i32, i32
  }
}

</mosaic_0001>

<bundles_post_ra>
// kernel: tpu_custom_call.1
= control target key start
LH: loop header
LB: loop body
LE: loop exit
PB: predicated region body
PF: predicated region fallthrough
CT: control target
= control target key end

     0   :  { %s334_s0 = inlined_call_operand.hbm [shape: s32[16], index: 0, kind: input, shape index: {}]   ;;  %s335_s1 = inlined_call_operand.hbm [shape: f32[32,32], index: 1, kind: input, shape index: {}]   ;;  %s336_s2 = inlined_call_operand.hbm [shape: f32[16,32], index: 2, kind: output, shape index: {}]  }
   0x1   :  { %s178_s11 = scalar_lea.hbm %s334_s0, 16 }
   0x2   :  { %p179_p0 = scmp.ne.s32.totalorder %s334_s0, %s178_s11  ;;  %p182_p1 = scmp.lt.u32.totalorder %s178_s11, %s334_s0 }
   0x4   :  { %p184_p2 = pnand %p182_p1, %p179_p0 }
   0x6   :  { %187 = shalt.err (!%p184_p2)  }
   0x7   :  { %s238_s16 = smov [#allocation3]  }
   0x8   :  { %8 = dma.hbm_to_smem %s334_s0, 16, %s238_s16, [#allocation2] }
   0x9   :  { %232 = dma.done.wait [#allocation2], 16 }
   0xa   :  { %233 = vsyncadd [#allocation2], 4294967280 }
   0xb   :  { %10 = sfence }
   0xc   :  { %11 = vsyncpa [#allocation5], 0 }
   0xd   :  { %12 = vsyncpa [#allocation6], 0  ;;  %s239_s19 = smov [#allocation4]   ;;  %s188_s23 = scalar_lea.hbm %s335_s1, 512 }
   0xe   :  { %s18_s20 = sshll.u32 %s239_s19, 4  ;;  %p189_p3 = scmp.ne.s32.totalorder %s335_s1, %s188_s23  ;;  %s19_s20 = int_to_ptr.vmem [resolvable:$true] %s18_s20 }
   0xf   :  { %p192_p4 = scmp.lt.u32.totalorder %s188_s23, %s335_s1 }
  0x11   :  { %p194_p5 = pnand %p192_p4, %p189_p3 }
  0x13   :  { %197 = shalt.err (!%p194_p5)
}
  0x14   :  { %s198_s0 = scalar_lea.vmem %s19_s20, 512  ;;  %p203_p7 = scmp.lt.s32.totalorder %s19_s20, %s19_s20 }
  0x15   :  { %p199_p6 = scmp.ne.s32.totalorder %s19_s20, %s198_s0  ;;  %p204_p8 = scmp.lt.s32.totalorder %s198_s0, %s198_s0 }
  0x17   :  { %p205_p9 = por %p204_p8, %p203_p7 }
  0x19   :  { %p206_p10 = pnand %p205_p9, %p199_p6 }
  0x1b   :  { %209 = shalt.err (!%p206_p10)
}
  0x1c   :  { %s240_s28 = smov 128   ;;  %s241_s29 = smov 8  }
  0x1d   :  { %24 = dma.hbm_to_vmem [thread:$0]  %s335_s1, 512, %s19_s20, [#allocation5], %s240_s28, %s240_s28, %s241_s29  }
  0x1e   :  { %234 = dma.done.wait [#allocation5], 512  }
  0x1f   :  { %235 = vsyncadd [#allocation5], 4294966784  ;;  %s29_s4 = sld [smem:[#allocation3]]  ;;  %s158_s5 = sld [smem:[#allocation3 + $0x1]]  ;;  %vm33_vm0 = vcmask 253952  }
  0x20   :  { %s159_s6 = sld [smem:[#allocation3 + $0x2]]  ;;  %s160_s7 = sld [smem:[#allocation3 + $0x3]] }
  0x21   :  { %s161_s8 = sld [smem:[#allocation3 + $0x4]]  ;;  %s162_s9 = sld [smem:[#allocation3 + $0x5]] }
  0x22   :  { %s285_s10 = sld [smem:[#allocation3 + $0x6]]  ;;  %s287_s11 = sld [smem:[#allocation3 + $0x7]] }
  0x23   :  { %s289_s12 = sld [smem:[#allocation3 + $0x8]]  ;;  %s291_s13 = sld [smem:[#allocation3 + $0x9]] }
  0x24   :  { %s293_s14 = sld [smem:[#allocation3 + $0xa]]  ;;  %s295_s15 = sld [smem:[#allocation3 + $0xb]] }
  0x25   :  { %s30_s1 = scalar_lea.vmem [#allocation4], %s29_s4  ;;  %s37_s16 = scalar_lea.vmem [#allocation4], %s158_s5 }
  0x26   :  { %v31_v0 = vld [vmem:[%s30_s1] sm:$0x1]  ;;  %s43_s17 = scalar_lea.vmem [#allocation4], %s159_s6  ;;  %s49_s18 = scalar_lea.vmem [#allocation4], %s160_s7 }
  0x27   :  { %v38_v1 = vld [vmem:[%s37_s16] sm:$0x1]  ;;  %v32_v2 = vmul.f32 5.656854, %v31_v0  ;;  %s55_s19 = scalar_lea.vmem [#allocation4], %s161_s8  ;;  %s61_s20 = scalar_lea.vmem [#allocation4], %s162_s9 }
  0x28   :  { %v39_v3 = vmul.f32 5.656854, %v38_v1  ;;  %v44_v4 = vld [vmem:[%s43_s17] sm:$0x1]  ;;  %s67_s21 = scalar_lea.vmem [#allocation4], %s285_s10  ;;  %s73_s22 = scalar_lea.vmem [#allocation4], %s287_s11 }
  0x29   :  { %v45_v5 = vmul.f32 5.656854, %v44_v4  ;;  %v50_v6 = vld [vmem:[%s49_s18] sm:$0x1]  ;;  %34 = vst.msk [vmem:[#allocation7] sm:$0x1] %vm33_vm0, %v32_v2 }
  0x2a   :  { %40 = vst.msk [vmem:[#allocation7 + $0x1] sm:$0x1] %vm33_vm0, %v39_v3  ;;  %v51_v7 = vmul.f32 5.656854, %v50_v6  ;;  %v56_v8 = vld [vmem:[%s55_s19] sm:$0x1] }
  0x2b   :  { %v62_v9 = vld [vmem:[%s61_s20] sm:$0x1]  ;;  %46 = vst.msk [vmem:[#allocation7 + $0x2] sm:$0x1] %vm33_vm0, %v45_v5  ;;  %v57_v10 = vmul.f32 5.656854, %v56_v8 }
  0x2c   :  { %v63_v11 = vmul.f32 5.656854, %v62_v9  ;;  %52 = vst.msk [vmem:[#allocation7 + $0x3] sm:$0x1] %vm33_vm0, %v51_v7  ;;  %v68_v12 = vld [vmem:[%s67_s21] sm:$0x1] }
  0x2d   :  { %v74_v13 = vld [vmem:[%s73_s22] sm:$0x1]  ;;  %58 = vst.msk [vmem:[#allocation7 + $0x4] sm:$0x1] %vm33_vm0, %v57_v10  ;;  %v69_v14 = vmul.f32 5.656854, %v68_v12 }
  0x2e   :  { %64 = vst.msk [vmem:[#allocation7 + $0x5] sm:$0x1] %vm33_vm0, %v63_v11  ;;  %v75_v15 = vmul.f32 5.656854, %v74_v13  ;;  %s79_s23 = scalar_lea.vmem [#allocation4], %s289_s12  ;;  %s85_s24 = scalar_lea.vmem [#allocation4], %s291_s13 }
  0x2f   :  { %v80_v16 = vld [vmem:[%s79_s23] sm:$0x1]  ;;  %70 = vst.msk [vmem:[#allocation7 + $0x6] sm:$0x1] %vm33_vm0, %v69_v14  ;;  %s91_s25 = scalar_lea.vmem [#allocation4], %s293_s14  ;;  %s97_s26 = scalar_lea.vmem [#allocation4], %s295_s15 }
  0x30   :  { %v81_v17 = vmul.f32 5.656854, %v80_v16  ;;  %v86_v18 = vld [vmem:[%s85_s24] sm:$0x1]  ;;  %76 = vst.msk [vmem:[#allocation7 + $0x7] sm:$0x1] %vm33_vm0, %v75_v15 }
  0x31   :  { %v87_v19 = vmul.f32 5.656854, %v86_v18  ;;  %v92_v20 = vld [vmem:[%s91_s25] sm:$0x1]  ;;  %s169_s27 = sld [smem:[#allocation3 + $0xc]]  ;;  %s170_s0 = sld [smem:[#allocation3 + $0xd]] }
  0x32   :  { %v98_v21 = vld [vmem:[%s97_s26] sm:$0x1]  ;;  %82 = vst.msk [vmem:[#allocation7 + $0x8] sm:$0x1] %vm33_vm0, %v81_v17  ;;  %v93_v22 = vmul.f32 5.656854, %v92_v20 }
  0x33   :  { %v99_v23 = vmul.f32 5.656854, %v98_v21  ;;  %88 = vst.msk [vmem:[#allocation7 + $0x9] sm:$0x1] %vm33_vm0, %v87_v19  ;;  %s171_s30 = sld [smem:[#allocation3 + $0xe]]  ;;  %s172_s3 = sld [smem:[#allocation3 + $0xf]] }
  0x34   :  { %94 = vst.msk [vmem:[#allocation7 + $0xa] sm:$0x1] %vm33_vm0, %v93_v22  ;;  %s242_s4 = smov [#allocation7]  }
  0x35   :  { %100 = vst.msk [vmem:[#allocation7 + $0xb] sm:$0x1] %vm33_vm0, %v99_v23  ;;  %s130_s5 = sshll.u32 %s242_s4, 4  ;;  %s131_s5 = int_to_ptr.vmem [resolvable:$true] %s130_s5 }
  0x36   :  { %s210_s10 = scalar_lea.vmem %s131_s5, 256  ;;  %p215_p12 = scmp.lt.s32.totalorder %s131_s5, %s131_s5 }
  0x37   :  { %s103_s6 = scalar_lea.vmem [#allocation4], %s169_s27  ;;  %s109_s7 = scalar_lea.vmem [#allocation4], %s170_s0 }
  0x38   :  { %v104_v24 = vld [vmem:[%s103_s6] sm:$0x1]  ;;  %p211_p11 = scmp.ne.s32.totalorder %s131_s5, %s210_s10  ;;  %p216_p13 = scmp.lt.s32.totalorder %s210_s10, %s210_s10 }
  0x39   :  { %v105_v25 = vmul.f32 5.656854, %v104_v24  ;;  %v110_v26 = vld [vmem:[%s109_s7] sm:$0x1]  ;;  %s115_s8 = scalar_lea.vmem [#allocation4], %s171_s30  ;;  %s121_s9 = scalar_lea.vmem [#allocation4], %s172_s3 }
  0x3a   :  { %v116_v27 = vld [vmem:[%s115_s8] sm:$0x1]  ;;  %v111_v28 = vmul.f32 5.656854, %v110_v26  ;;  %p217_p0 = por %p216_p13, %p215_p12 }
  0x3b   :  { %v117_v29 = vmul.f32 5.656854, %v116_v27  ;;  %106 = vst.msk [vmem:[#allocation7 + $0xc] sm:$0x1] %vm33_vm0, %v105_v25  ;;  %v122_v30 = vld [vmem:[%s121_s9] sm:$0x1] }
  0x3c   :  { %112 = vst.msk [vmem:[#allocation7 + $0xd] sm:$0x1] %vm33_vm0, %v111_v28  ;;  %v123_v31 = vmul.f32 5.656854, %v122_v30  ;;  %p218_p1 = pnand %p217_p0, %p211_p11 }
  0x3d   :  { %118 = vst.msk [vmem:[#allocation7 + $0xe] sm:$0x1] %vm33_vm0, %v117_v29 }
  0x3e   :  { %124 = vst.msk [vmem:[#allocation7 + $0xf] sm:$0x1] %vm33_vm0, %v123_v31 }
  0x3f   :  { %221 = shalt.err (!%p218_p1)
}
  0x40   :  { %s222_s13 = scalar_lea.hbm %s336_s2, 256 }
  0x41   :  { %p223_p2 = scmp.ne.s32.totalorder %s336_s2, %s222_s13  ;;  %p226_p3 = scmp.lt.u32.totalorder %s222_s13, %s336_s2 }
  0x43   :  { %p228_p4 = pnand %p226_p3, %p223_p2 }
  0x45   :  { %231 = shalt.err (!%p228_p4)
}
  0x46   :  { %136 = dma.vmem_to_hbm [thread:$0]  %s131_s5, 256, %s336_s2, [#allocation6], %s240_s28, %s240_s28, %s241_s29  }
  0x47   :  { %236 = dma.done.wait [#allocation6], 256  }
  0x48   :  { %237 = vsyncadd [#allocation6], 4294967040 }
  0x49   :  { %140 = vsyncpa [#allocation5], 1 }
  0x4a   :  { %141 = vsyncpa [#allocation6], 1 }

</bundles_post_ra>
